<compile_context>
chip_gen: v7x
topology: tpu7x:2x2x1
jax: 0.10.0
libtpu: 0.0.40
codegen_flags: <defaults>
</compile_context>

<pallas_src>
import jax
import jax.numpy as jnp
from jax.experimental import pallas as pl
from jax.experimental.pallas import tpu as pltpu


def build_grid(resolution):
    """JAX replica of the PyTorch build_grid: returns (1, H, W, 4) float32."""
    ranges = [jnp.linspace(0.0, 1.0, num=res, dtype=jnp.float32) for res in resolution]
    mesh = jnp.meshgrid(*ranges, indexing="ij")           # torch.meshgrid default 'ij'
    grid = jnp.stack(mesh, axis=-1)                       # (H, W, 2)
    grid = jnp.reshape(grid, (resolution[0], resolution[1], -1))
    grid = grid[None]                                     # (1, H, W, 2)
    return jnp.concatenate([grid, 1.0 - grid], axis=-1)   # (1, H, W, 4)


def _add_embed_kernel(emb_ref, x_ref, o_ref):
    # emb_ref: (C, hw_t) f32 — batch-invariant positional embedding tile.
    # x_ref / o_ref: (TB, C, hw_t) — a tile of the flattened NCHW input.
    o_ref[...] = x_ref[...] + emb_ref[...][None, :, :].astype(o_ref.dtype)


def _pick_hw_tile(HW, row_bytes, budget=8 << 20):
    """Largest chunk of HW (divisor, multiple of 128) keeping a block <= budget."""
    if HW * row_bytes <= budget:
        return HW
    t = HW
    while t % 256 == 0 and t * row_bytes > budget:
        t //= 2
    return t


@jax.jit
def position_embed(inputs, weight, bias, grid):
    """inputs: (B, C, H, W) NCHW; weight: (C, 4); bias: (C,); grid: (1, H, W, 4)."""
    B, C, H, W = inputs.shape
    HW = H * W
    x_flat = inputs.reshape(B, C, HW)

    # Hoisted, batch-invariant dense(grid) + bias -> (C, HW) in f32.
    # (K=4 matmul done once here instead of once per grid step on the MXU.)
    emb = (
        jnp.einsum("hwk,ck->chw", grid[0], weight, preferred_element_type=jnp.float32)
        + bias[:, None, None]
    ).reshape(C, HW)

    # Batch tiling: >=2 parallel steps when possible (feeds both v7x TCs),
    # otherwise a single fat block (minimal step overhead on v5e/v6e).
    TB = B // 2 if (B >= 2 and B % 2 == 0) else B
    n_bt = B // TB

    # HW tiling: full slab at small shapes; lane-multiple tiles when large so
    # double-buffered blocks fit comfortably in VMEM on all generations.
    itemsize = jnp.dtype(inputs.dtype).itemsize
    hw_t = _pick_hw_tile(HW, TB * C * itemsize)
    n_hw = HW // hw_t

    out_flat = pl.pallas_call(
        _add_embed_kernel,
        out_shape=jax.ShapeDtypeStruct((B, C, HW), inputs.dtype),
        grid_spec=pltpu.PrefetchScalarGridSpec(
            num_scalar_prefetch=0,
            grid=(n_bt, n_hw),
            in_specs=[
                pl.BlockSpec((C, hw_t), lambda b, h: (0, h)),         # emb (reused)
                pl.BlockSpec((TB, C, hw_t), lambda b, h: (b, 0, h)),  # x tile
            ],
            out_specs=pl.BlockSpec((TB, C, hw_t), lambda b, h: (b, 0, h)),
        ),
        input_output_aliases={1: 0},  # in-place add into x's buffer
        compiler_params=pltpu.CompilerParams(
            dimension_semantics=("parallel", "parallel"),
        ),
    )(emb, x_flat)

    return out_flat.reshape(B, C, H, W)


if __name__ == "__main__":
    hidden_size = 32
    resolution = (16, 16)
    B = 2

    key = jax.random.PRNGKey(0)
    k_w, k_b, k_x = jax.random.split(key, 3)

    # Deterministic synthetic parameters (nn.Linear(4, hidden_size) shapes).
    weight = jax.random.normal(k_w, (hidden_size, 4), dtype=jnp.float32) * 0.5
    bias = jax.random.normal(k_b, (hidden_size,), dtype=jnp.float32) * 0.1

    grid = build_grid(resolution)                       # (1, 16, 16, 4)
    x = jax.random.normal(
        k_x, (B, hidden_size, resolution[0], resolution[1]), dtype=jnp.float32
    )                                                   # NCHW

    # Pure-JAX reference: dense(grid) -> (1, H, W, C) -> permute -> (1, C, H, W); add.
    emb_ref = jnp.einsum("bhwk,ck->bhwc", grid, weight) + bias
    emb_ref = jnp.transpose(emb_ref, (0, 3, 1, 2))
    ref = x + emb_ref

    out = position_embed(x, weight, bias, grid)
    out = jax.block_until_ready(out)

    assert out.shape == x.shape
    assert jnp.allclose(out, ref, atol=1e-5, rtol=1e-5)

    print("KERNEL_OK")
</pallas_src>

<mosaic_0001>
module attributes {stable_mosaic.version = 11 : i64} {
  func.func @_add_embed_kernel(%arg0: i32, %arg1: i32, %arg2: memref<32x256xf32, #tpu.memory_space<vmem>>, %arg3: memref<1x32x256xf32, #tpu.memory_space<vmem>>, %arg4: memref<1x32x256xf32, #tpu.memory_space<vmem>>) attributes {dimension_semantics = [#tpu.dimension_semantics<parallel>, #tpu.dimension_semantics<parallel>], iteration_bounds = array<i64: 2, 1>, scalar_prefetch = 0 : i64, scratch_operands = 0 : i64, tpu.core_type = #tpu.core_type<tc>, window_params = [{transform_indices = @transform_0, window_bounds = array<i64: 32, 256>}, {transform_indices = @transform_1, window_bounds = array<i64: 1, 32, 256>}, {transform_indices = @transform_2, window_bounds = array<i64: 1, 32, 256>}]} {
    %c0 = arith.constant 0 : index
    %c0_0 = arith.constant 0 : index
    %c0_1 = arith.constant 0 : index
    %0 = vector.load %arg3[%c0, %c0_0, %c0_1] : memref<1x32x256xf32, #tpu.memory_space<vmem>>, vector<1x32x256xf32>
    %c0_2 = arith.constant 0 : index
    %c0_3 = arith.constant 0 : index
    %1 = vector.load %arg2[%c0_2, %c0_3] : memref<32x256xf32, #tpu.memory_space<vmem>>, vector<32x256xf32>
    %2 = vector.shape_cast %1 : vector<32x256xf32> to vector<1x32x256xf32>
    %3 = arith.addf %0, %2 : vector<1x32x256xf32>
    %c0_4 = arith.constant 0 : index
    %c0_5 = arith.constant 0 : index
    %c0_6 = arith.constant 0 : index
    %4 = vector.load %arg4[%c0_4, %c0_5, %c0_6] : memref<1x32x256xf32, #tpu.memory_space<vmem>>, vector<1x32x256xf32>
    tpu.vector_store %arg4[%c0_4, %c0_5, %c0_6], %3 {strides = array<i32>} : memref<1x32x256xf32, #tpu.memory_space<vmem>>, vector<1x32x256xf32>,
    return
  }
  func.func @transform_0(%arg0: i32, %arg1: i32) -> (i32, i32) {
    %c0_i32 = arith.constant 0 : i32
    %c0_i32_0 = arith.constant 0 : i32
    return %c0_i32, %arg1 : i32, i32
  }
  func.func @transform_1(%arg0: i32, %arg1: i32) -> (i32, i32, i32) {
    %c0_i32 = arith.constant 0 : i32
    %c0_i32_0 = arith.constant 0 : i32
    return %arg0, %c0_i32, %arg1 : i32, i32, i32
  }
  func.func @transform_2(%arg0: i32, %arg1: i32) -> (i32, i32, i32) {
    %c0_i32 = arith.constant 0 : i32
    %c0_i32_0 = arith.constant 0 : i32
    return %arg0, %c0_i32, %arg1 : i32, i32, i32
  }
}

</mosaic_0001>

<bundles_post_ra>
// kernel: position_embed.1
= control target key start
LH: loop header
LB: loop body
LE: loop exit
PB: predicated region body
PF: predicated region fallthrough
CT: control target
= control target key end

     0   :  { %s416_s9 = smov 0   ;;  %s418_s10 = smov 0   ;;  %s473_s0 = inlined_call_operand.vmem [shape: f32[32,256], index: 0, kind: input, shape index: {}]   ;;  %s474_s1 = inlined_call_operand.vmem [shape: f32[2,32,256], index: 1, kind: input, shape index: {}, may-alias: {1,2}]   ;;  %s475_s2 = inlined_call_operand.vmem [shape: f32[2,32,256], index: 2, kind: output, shape index: {}, may-alias: {1,2}]  }
   0x1   :  { %s420_s11 = smov 0  }
   0x2 LB: > { %s24_s12 = sadd.s32 1, %s395_s10  ;;  %p344_p0 = scmp.ge.s32.totalorder %s399_s11, 1  ;;  %s399_s11 = sphi %s420_s11, %s12_s11   ;;  %s395_s10 = sphi %s418_s10, %s477_s10   ;;  %s391_s9 = sphi %s416_s9, %s476_s9  }
   0x3   : > { %p26_p1 = scmp.ge.s32.totalorder %s24_s12, 2  ;;  %p144_p2 = scmp.lt.s32.totalorder %s399_s11, 3 }
   0x5   : > { %s479_s12 = smov (%p26_p1, %s24_s12), 0  ;;  %p145_p3 = pnand %p344_p0, %p144_p2 }
   0x6   : > { %p186_p4 = scmp.lt.s32.totalorder (!%p145_p3), %s391_s9, 1  ;;  %v213_v0 = vld [vmem:[%s473_s0] sm:$0xff] (!%p145_p3)  ;;  %v214_v1 = vld [vmem:[%s473_s0 + $0x8] sm:$0xff] (!%p145_p3)  ;;  %v215_v2 = vld [vmem:[%s473_s0 + $0x10] sm:$0xff] (!%p145_p3) }
   0x7   : > { %148 = sbr.rel (%p145_p3) target bundleno = 24 (0x18), region = 28  ;;  %v216_v3 = vld [vmem:[%s473_s0 + $0x18] sm:$0xff] (!%p145_p3)  ;;  %v217_v4 = vld [vmem:[%s473_s0 + $0x20] sm:$0xff] (!%p145_p3)  ;;  %v218_v5 = vld [vmem:[%s473_s0 + $0x28] sm:$0xff] (!%p145_p3) }
   0x8   : > { %v219_v6 = vld [vmem:[%s473_s0 + $0x30] sm:$0xff] (!%p145_p3)  ;;  %v220_v7 = vld [vmem:[%s473_s0 + $0x38] sm:$0xff] (!%p145_p3) }
   0xe   : > { %s481_s9 = smov (!%p186_p4, %s391_s9), 1 }
   0xf   : > { %s351_s17 = sshll.u32 %s481_s9, 6 }
  0x10   : > { %s193_s26 = scalar_lea.vmem %s474_s1, %s351_s17  ;;  %s203_s7 = scalar_lea.vmem %s475_s2, %s351_s17 }
  0x11   : > { %v205_v8 = vld [vmem:[%s193_s26] sm:$0xff]  ;;  %v206_v9 = vld [vmem:[%s193_s26 + $0x8] sm:$0xff]  ;;  %v207_v10 = vld [vmem:[%s193_s26 + $0x10] sm:$0xff] }
  0x12   : > { %v208_v11 = vld [vmem:[%s193_s26 + $0x18] sm:$0xff]  ;;  %v209_v12 = vld [vmem:[%s193_s26 + $0x20] sm:$0xff]  ;;  %v210_v13 = vld [vmem:[%s193_s26 + $0x28] sm:$0xff]  ;;  %v221_v14 = vadd.f32 %v213_v0, %v205_v8  ;;  %v222_v15 = vadd.f32 %v214_v1, %v206_v9  ;;  %v223_v16 = vadd.f32 %v215_v2, %v207_v10 }
  0x13   : > { %v211_v17 = vld [vmem:[%s193_s26 + $0x30] sm:$0xff]  ;;  %v212_v18 = vld [vmem:[%s193_s26 + $0x38] sm:$0xff]  ;;  %v224_v19 = vadd.f32 %v216_v3, %v208_v11  ;;  %v225_v20 = vadd.f32 %v217_v4, %v209_v12  ;;  %v226_v21 = vadd.f32 %v218_v5, %v210_v13 }
  0x14   : > { %v227_v22 = vadd.f32 %v219_v6, %v211_v17  ;;  %v228_v23 = vadd.f32 %v220_v7, %v212_v18  ;;  %229 = vst [vmem:[%s203_s7] sm:$0xff] %v221_v14  ;;  %230 = vst [vmem:[%s203_s7 + $0x8] sm:$0xff] %v222_v15 }
  0x15   : > { %231 = vst [vmem:[%s203_s7 + $0x10] sm:$0xff] %v223_v16  ;;  %232 = vst [vmem:[%s203_s7 + $0x18] sm:$0xff] %v224_v19 }
  0x16   : > { %233 = vst [vmem:[%s203_s7 + $0x20] sm:$0xff] %v225_v20  ;;  %234 = vst [vmem:[%s203_s7 + $0x28] sm:$0xff] %v226_v21 }
  0x17   : > { %235 = vst [vmem:[%s203_s7 + $0x30] sm:$0xff] %v227_v22  ;;  %236 = vst [vmem:[%s203_s7 + $0x38] sm:$0xff] %v228_v23 }
  0x18 PF: > { %s12_s11 = sadd.s32 1, %s399_s11   ;;  %s476_s9 = smov %s395_s10 }
  0x19   : > { %p9_p5 = scmp.ge.s32.totalorder %s12_s11, 4   ;;  %s477_s10 = smov %s479_s12 }
  0x1b   :  { %11 = sbr.rel (!%p9_p5) target bundleno = 2 (0x2), region = 61 }

</bundles_post_ra>
